<compile_context>
chip_gen: v7x
topology: tpu7x:2x2x1
jax: 0.10.0
libtpu: 0.0.40
codegen_flags: <defaults>
</compile_context>

<pallas_src>
import jax
import jax.numpy as jnp
from jax.experimental import pallas as pl
from jax.experimental.pallas import tpu as pltpu

LANE = 128  # pad Cout up to one full lane group


def _round_up(x, m):
    return (x + m - 1) // m * m


# ----------------------------------------------------------------------------
# Pallas kernels
# ----------------------------------------------------------------------------
def matmul_bias_relu_kernel(x_ref, w_ref, b_ref, o_ref):
    # x: (tm, K) bf16, w: (K, 128) bf16, b: (1, 128) f32 -> o: (tm, 128) f32
    acc = jnp.dot(x_ref[...], w_ref[...], preferred_element_type=jnp.float32)
    o_ref[...] = jnp.maximum(acc + b_ref[...], 0.0).astype(o_ref.dtype)


def matmul_bias_relu_pool_kernel(x_ref, w_ref, b_ref, pool_ref, o_ref):
    # x: (tb*P, K) bf16, w: (K, 128) bf16, b: (1, 128) f32,
    # pool: (tb, tb*P) f32 block-diagonal averaging matrix -> o: (tb, 128) f32
    acc = jnp.dot(x_ref[...], w_ref[...], preferred_element_type=jnp.float32)
    acc = jnp.maximum(acc + b_ref[...], 0.0)
    o_ref[...] = jnp.dot(pool_ref[...], acc,
                         preferred_element_type=jnp.float32).astype(o_ref.dtype)


# ----------------------------------------------------------------------------
# XLA glue: NHWC im2col + torch weight flattening (layout plumbing only)
# ----------------------------------------------------------------------------
def _im2col_nhwc(x, k=3, stride=2, pad=1):
    """x: (B, H, W, C) -> (B*OH*OW, k*k*C) with feature order (KH, KW, Cin)."""
    B, H, W, C = x.shape
    xp = jnp.pad(x, ((0, 0), (pad, pad), (pad, pad), (0, 0)))
    OH = (H + 2 * pad - k) // stride + 1
    OW = (W + 2 * pad - k) // stride + 1
    taps = []
    for di in range(k):
        for dj in range(k):
            taps.append(xp[:, di:di + stride * OH:stride,
                           dj:dj + stride * OW:stride, :])   # (B, OH, OW, C)
    p = jnp.concatenate(taps, axis=-1)                        # (B, OH, OW, k*k*C)
    return p.reshape(B * OH * OW, k * k * C), OH, OW


def _flatten_weight(weight, bias):
    """(Cout, Cin, KH, KW) torch layout -> bf16 (KH*KW*Cin, 128), f32 (1, 128)."""
    Cout, Cin, KH, KW = weight.shape
    K = KH * KW * Cin
    # feature order (KH, KW, Cin) to match _im2col_nhwc
    w_flat = jnp.transpose(weight, (2, 3, 1, 0)).reshape(K, Cout)
    w_pad = jnp.zeros((K, LANE), jnp.bfloat16).at[:, :Cout].set(
        w_flat.astype(jnp.bfloat16))
    b_pad = jnp.zeros((1, LANE), jnp.float32).at[:, :Cout].set(
        bias.astype(jnp.float32).reshape(1, Cout))
    return w_pad, b_pad


# ----------------------------------------------------------------------------
# Layer wrappers
# ----------------------------------------------------------------------------
def conv3x3_s2_p1_relu(x, weight, bias, *, tile_m=512):
    """NHWC Conv2d(k=3, s=2, p=1) + ReLU -> NHWC output, via M-tiled MXU matmul."""
    B = x.shape[0]
    Cout = weight.shape[0]
    patches, OH, OW = _im2col_nhwc(x)
    M, K = patches.shape
    w_pad, b_pad = _flatten_weight(weight, bias)

    tm = min(tile_m, _round_up(M, 8))
    M_pad = _round_up(M, tm)
    patches = patches.astype(jnp.bfloat16)
    if M_pad != M:
        patches = jnp.pad(patches, ((0, M_pad - M), (0, 0)))

    out = pl.pallas_call(
        matmul_bias_relu_kernel,
        out_shape=jax.ShapeDtypeStruct((M_pad, LANE), jnp.float32),
        grid=(M_pad // tm,),
        in_specs=[
            pl.BlockSpec((tm, K), lambda i: (i, 0)),
            pl.BlockSpec((K, LANE), lambda i: (0, 0)),
            pl.BlockSpec((1, LANE), lambda i: (0, 0)),
        ],
        out_specs=pl.BlockSpec((tm, LANE), lambda i: (i, 0)),
        compiler_params=pltpu.CompilerParams(
            dimension_semantics=("parallel",),
            vmem_limit_bytes=32 * 1024 * 1024),
        cost_estimate=pl.CostEstimate(
            flops=2 * M_pad * K * LANE,
            transcendentals=0,
            bytes_accessed=M_pad * K * 2 + K * LANE * 2 + LANE * 4
                           + M_pad * LANE * 4),
    )(patches, w_pad, b_pad)

    return out[:M, :Cout].reshape(B, OH, OW, Cout)


def conv3x3_s2_p1_relu_avgpool(x, weight, bias, *, tile_b=16):
    """NHWC Conv(k3,s2,p1) + ReLU + full-spatial average pool, fused in-kernel.

    Valid because avg_pool2d(4) on the 4x4 conv3 map pools the whole spatial
    extent: each batch element owns 16 contiguous matmul rows. Returns (B, Cout).
    """
    B = x.shape[0]
    Cout = weight.shape[0]
    patches, OH, OW = _im2col_nhwc(x)
    P = OH * OW                                 # 16
    M, K = patches.shape                        # M = B * P
    w_pad, b_pad = _flatten_weight(weight, bias)

    tb = min(tile_b, B)
    B_pad = _round_up(B, tb)
    patches = patches.astype(jnp.bfloat16)
    if B_pad != B:
        patches = jnp.pad(patches, ((0, (B_pad - B) * P), (0, 0)))
    # block-diagonal averaging matrix: row i has 1/P over columns [i*P, (i+1)*P)
    pool_mat = jnp.repeat(jnp.eye(tb, dtype=jnp.float32), P, axis=1) / P

    out = pl.pallas_call(
        matmul_bias_relu_pool_kernel,
        out_shape=jax.ShapeDtypeStruct((B_pad, LANE), jnp.float32),
        grid=(B_pad // tb,),
        in_specs=[
            pl.BlockSpec((tb * P, K), lambda i: (i, 0)),
            pl.BlockSpec((K, LANE), lambda i: (0, 0)),
            pl.BlockSpec((1, LANE), lambda i: (0, 0)),
            pl.BlockSpec((tb, tb * P), lambda i: (0, 0)),
        ],
        out_specs=pl.BlockSpec((tb, LANE), lambda i: (i, 0)),
        compiler_params=pltpu.CompilerParams(
            dimension_semantics=("parallel",),
            vmem_limit_bytes=32 * 1024 * 1024),
        cost_estimate=pl.CostEstimate(
            flops=2 * B_pad * P * K * LANE + 2 * B_pad * P * LANE,
            transcendentals=0,
            bytes_accessed=B_pad * P * K * 2 + K * LANE * 2 + LANE * 4
                           + tb * tb * P * 4 + B_pad * LANE * 4),
    )(patches, w_pad, b_pad, pool_mat)

    return out[:B, :Cout]


# ----------------------------------------------------------------------------
# Model
# ----------------------------------------------------------------------------
def init_params(key):
    """Deterministic init mimicking torch Conv2d default (uniform +/- 1/sqrt(fan_in))."""
    params = {}
    shapes = {
        "conv1": (16, 1, 3, 3),
        "conv2": (16, 16, 3, 3),
        "conv3": (10, 16, 3, 3),
    }
    for name, wshape in shapes.items():
        key, kw, kb = jax.random.split(key, 3)
        fan_in = wshape[1] * wshape[2] * wshape[3]
        bound = 1.0 / jnp.sqrt(jnp.float32(fan_in))
        params[name] = {
            "w": jax.random.uniform(kw, wshape, jnp.float32, -bound, bound),
            "b": jax.random.uniform(kb, (wshape[0],), jnp.float32, -bound, bound),
        }
    return params


def mnist_cnn_forward(params, xb):
    B = xb.shape[0]
    # xb.view(-1, 1, 28, 28); with C=1 the NHWC view holds identical data.
    x = xb.reshape(B, 28, 28, 1)
    x = conv3x3_s2_p1_relu(x, params["conv1"]["w"], params["conv1"]["b"])   # (B,14,14,16)
    x = conv3x3_s2_p1_relu(x, params["conv2"]["w"], params["conv2"]["b"])   # (B, 7, 7,16)
    x = conv3x3_s2_p1_relu_avgpool(x, params["conv3"]["w"], params["conv3"]["b"])  # (B,10)
    return x


if __name__ == "__main__":
    key = jax.random.PRNGKey(0)
    key, kx = jax.random.split(key)

    params = init_params(key)
    xb = jax.random.normal(kx, (2, 784), dtype=jnp.float32)  # batch of flattened MNIST images

    out = jax.jit(mnist_cnn_forward)(params, xb)
    out = jax.block_until_ready(out)

    assert out.shape == (2, 10), out.shape
    assert out.dtype == jnp.float32
    print("KERNEL_OK")
</pallas_src>

<mosaic_0001>
module attributes {stable_mosaic.version = 11 : i64} {
  func.func @matmul_bias_relu_kernel(%arg0: i32, %arg1: memref<392x9xbf16, #tpu.memory_space<vmem>>, %arg2: memref<9x128xbf16, #tpu.memory_space<vmem>>, %arg3: memref<1x128xf32, #tpu.memory_space<vmem>>, %arg4: memref<392x128xf32, #tpu.memory_space<vmem>>) attributes {dimension_semantics = [#tpu.dimension_semantics<parallel>], iteration_bounds = array<i64: 1>, scalar_prefetch = 0 : i64, scratch_operands = 0 : i64, tpu.core_type = #tpu.core_type<tc>, window_params = [{transform_indices = @transform_0, window_bounds = array<i64: 392, 9>}, {pipeline_mode = #tpu.pipeline_mode<synchronous>, transform_indices = @transform_1, window_bounds = array<i64: 9, 128>}, {pipeline_mode = #tpu.pipeline_mode<synchronous>, transform_indices = @transform_2, window_bounds = array<i64: 1, 128>}, {transform_indices = @transform_3, window_bounds = array<i64: 392, 128>}]} {
    %c0 = arith.constant 0 : index
    %c0_0 = arith.constant 0 : index
    %0 = vector.load %arg1[%c0, %c0_0] : memref<392x9xbf16, #tpu.memory_space<vmem>>, vector<392x9xbf16>
    %c0_1 = arith.constant 0 : index
    %c0_2 = arith.constant 0 : index
    %1 = vector.load %arg2[%c0_1, %c0_2] : memref<9x128xbf16, #tpu.memory_space<vmem>>, vector<9x128xbf16>
    %cst = arith.constant dense<0.000000e+00> : vector<392x128xf32>
    %2 = tpu.matmul %0, %1, %cst {dimension_numbers = #tpu.dot_dimension_numbers<[1], [0], [0], [1], [0, 0, 1, 1], [], []>} : vector<392x9xbf16>, vector<9x128xbf16>, vector<392x128xf32> -> vector<392x128xf32>
    %c0_3 = arith.constant 0 : index
    %c0_4 = arith.constant 0 : index
    %3 = vector.load %arg3[%c0_3, %c0_4] : memref<1x128xf32, #tpu.memory_space<vmem>>, vector<1x128xf32>
    %4 = vector.broadcast %3 : vector<1x128xf32> to vector<392x128xf32>
    %5 = arith.addf %2, %4 : vector<392x128xf32>
    %cst_5 = arith.constant 0.000000e+00 : f32
    %6 = vector.broadcast %cst_5 : f32 to vector<392x128xf32>
    %7 = arith.maximumf %5, %6 : vector<392x128xf32>
    %c0_6 = arith.constant 0 : index
    %c0_7 = arith.constant 0 : index
    %8 = vector.load %arg4[%c0_6, %c0_7] : memref<392x128xf32, #tpu.memory_space<vmem>>, vector<392x128xf32>
    tpu.vector_store %arg4[%c0_6, %c0_7], %7 {strides = array<i32>} : memref<392x128xf32, #tpu.memory_space<vmem>>, vector<392x128xf32>,
    return
  }
  func.func @transform_0(%arg0: i32) -> (i32, i32) {
    %c0_i32 = arith.constant 0 : i32
    %c0_i32_0 = arith.constant 0 : i32
    return %arg0, %c0_i32 : i32, i32
  }
  func.func @transform_1(%arg0: i32) -> (i32, i32) {
    %c0_i32 = arith.constant 0 : i32
    %c0_i32_0 = arith.constant 0 : i32
    %c0_i32_1 = arith.constant 0 : i32
    return %c0_i32, %c0_i32_0 : i32, i32
  }
  func.func @transform_2(%arg0: i32) -> (i32, i32) {
    %c0_i32 = arith.constant 0 : i32
    %c0_i32_0 = arith.constant 0 : i32
    %c0_i32_1 = arith.constant 0 : i32
    return %c0_i32, %c0_i32_0 : i32, i32
  }
  func.func @transform_3(%arg0: i32) -> (i32, i32) {
    %c0_i32 = arith.constant 0 : i32
    %c0_i32_0 = arith.constant 0 : i32
    return %arg0, %c0_i32 : i32, i32
  }
}

module attributes {stable_mosaic.version = 11 : i64} {
  func.func @matmul_bias_relu_kernel(%arg0: i32, %arg1: memref<104x144xbf16, #tpu.memory_space<vmem>>, %arg2: memref<144x128xbf16, #tpu.memory_space<vmem>>, %arg3: memref<1x128xf32, #tpu.memory_space<vmem>>, %arg4: memref<104x128xf32, #tpu.memory_space<vmem>>) attributes {dimension_semantics = [#tpu.dimension_semantics<parallel>], iteration_bounds = array<i64: 1>, scalar_prefetch = 0 : i64, scratch_operands = 0 : i64, tpu.core_type = #tpu.core_type<tc>, window_params = [{transform_indices = @transform_0, window_bounds = array<i64: 104, 144>}, {pipeline_mode = #tpu.pipeline_mode<synchronous>, transform_indices = @transform_1, window_bounds = array<i64: 144, 128>}, {pipeline_mode = #tpu.pipeline_mode<synchronous>, transform_indices = @transform_2, window_bounds = array<i64: 1, 128>}, {transform_indices = @transform_3, window_bounds = array<i64: 104, 128>}]} {
    %c0 = arith.constant 0 : index
    %c0_0 = arith.constant 0 : index
    %0 = vector.load %arg1[%c0, %c0_0] : memref<104x144xbf16, #tpu.memory_space<vmem>>, vector<104x144xbf16>
    %c0_1 = arith.constant 0 : index
    %c0_2 = arith.constant 0 : index
    %1 = vector.load %arg2[%c0_1, %c0_2] : memref<144x128xbf16, #tpu.memory_space<vmem>>, vector<144x128xbf16>
    %cst = arith.constant dense<0.000000e+00> : vector<104x128xf32>
    %2 = tpu.matmul %0, %1, %cst {dimension_numbers = #tpu.dot_dimension_numbers<[1], [0], [0], [1], [0, 0, 1, 1], [], []>} : vector<104x144xbf16>, vector<144x128xbf16>, vector<104x128xf32> -> vector<104x128xf32>
    %c0_3 = arith.constant 0 : index
    %c0_4 = arith.constant 0 : index
    %3 = vector.load %arg3[%c0_3, %c0_4] : memref<1x128xf32, #tpu.memory_space<vmem>>, vector<1x128xf32>
    %4 = vector.broadcast %3 : vector<1x128xf32> to vector<104x128xf32>
    %5 = arith.addf %2, %4 : vector<104x128xf32>
    %cst_5 = arith.constant 0.000000e+00 : f32
    %6 = vector.broadcast %cst_5 : f32 to vector<104x128xf32>
    %7 = arith.maximumf %5, %6 : vector<104x128xf32>
    %c0_6 = arith.constant 0 : index
    %c0_7 = arith.constant 0 : index
    %8 = vector.load %arg4[%c0_6, %c0_7] : memref<104x128xf32, #tpu.memory_space<vmem>>, vector<104x128xf32>
    tpu.vector_store %arg4[%c0_6, %c0_7], %7 {strides = array<i32>} : memref<104x128xf32, #tpu.memory_space<vmem>>, vector<104x128xf32>,
    return
  }
  func.func @transform_0(%arg0: i32) -> (i32, i32) {
    %c0_i32 = arith.constant 0 : i32
    %c0_i32_0 = arith.constant 0 : i32
    return %arg0, %c0_i32 : i32, i32
  }
  func.func @transform_1(%arg0: i32) -> (i32, i32) {
    %c0_i32 = arith.constant 0 : i32
    %c0_i32_0 = arith.constant 0 : i32
    %c0_i32_1 = arith.constant 0 : i32
    return %c0_i32, %c0_i32_0 : i32, i32
  }
  func.func @transform_2(%arg0: i32) -> (i32, i32) {
    %c0_i32 = arith.constant 0 : i32
    %c0_i32_0 = arith.constant 0 : i32
    %c0_i32_1 = arith.constant 0 : i32
    return %c0_i32, %c0_i32_0 : i32, i32
  }
  func.func @transform_3(%arg0: i32) -> (i32, i32) {
    %c0_i32 = arith.constant 0 : i32
    %c0_i32_0 = arith.constant 0 : i32
    return %arg0, %c0_i32 : i32, i32
  }
}

module attributes {stable_mosaic.version = 11 : i64} {
  func.func @matmul_bias_relu_pool_kernel(%arg0: i32, %arg1: memref<32x144xbf16, #tpu.memory_space<vmem>>, %arg2: memref<144x128xbf16, #tpu.memory_space<vmem>>, %arg3: memref<1x128xf32, #tpu.memory_space<vmem>>, %arg4: memref<2x32xf32, #tpu.memory_space<vmem>>, %arg5: memref<2x128xf32, #tpu.memory_space<vmem>>) attributes {dimension_semantics = [#tpu.dimension_semantics<parallel>], iteration_bounds = array<i64: 1>, scalar_prefetch = 0 : i64, scratch_operands = 0 : i64, tpu.core_type = #tpu.core_type<tc>, window_params = [{transform_indices = @transform_0, window_bounds = array<i64: 32, 144>}, {pipeline_mode = #tpu.pipeline_mode<synchronous>, transform_indices = @transform_1, window_bounds = array<i64: 144, 128>}, {pipeline_mode = #tpu.pipeline_mode<synchronous>, transform_indices = @transform_2, window_bounds = array<i64: 1, 128>}, {pipeline_mode = #tpu.pipeline_mode<synchronous>, transform_indices = @transform_3, window_bounds = array<i64: 2, 32>}, {transform_indices = @transform_4, window_bounds = array<i64: 2, 128>}]} {
    %c0 = arith.constant 0 : index
    %c0_0 = arith.constant 0 : index
    %0 = vector.load %arg1[%c0, %c0_0] : memref<32x144xbf16, #tpu.memory_space<vmem>>, vector<32x144xbf16>
    %c0_1 = arith.constant 0 : index
    %c0_2 = arith.constant 0 : index
    %1 = vector.load %arg2[%c0_1, %c0_2] : memref<144x128xbf16, #tpu.memory_space<vmem>>, vector<144x128xbf16>
    %cst = arith.constant dense<0.000000e+00> : vector<32x128xf32>
    %2 = tpu.matmul %0, %1, %cst {dimension_numbers = #tpu.dot_dimension_numbers<[1], [0], [0], [1], [0, 0, 1, 1], [], []>} : vector<32x144xbf16>, vector<144x128xbf16>, vector<32x128xf32> -> vector<32x128xf32>
    %c0_3 = arith.constant 0 : index
    %c0_4 = arith.constant 0 : index
    %3 = vector.load %arg3[%c0_3, %c0_4] : memref<1x128xf32, #tpu.memory_space<vmem>>, vector<1x128xf32>
    %4 = vector.broadcast %3 : vector<1x128xf32> to vector<32x128xf32>
    %5 = arith.addf %2, %4 : vector<32x128xf32>
    %cst_5 = arith.constant 0.000000e+00 : f32
    %6 = vector.broadcast %cst_5 : f32 to vector<32x128xf32>
    %7 = arith.maximumf %5, %6 : vector<32x128xf32>
    %c0_6 = arith.constant 0 : index
    %c0_7 = arith.constant 0 : index
    %8 = vector.load %arg4[%c0_6, %c0_7] : memref<2x32xf32, #tpu.memory_space<vmem>>, vector<2x32xf32>
    %cst_8 = arith.constant dense<0.000000e+00> : vector<2x128xf32>
    %9 = tpu.matmul %8, %7, %cst_8 {dimension_numbers = #tpu.dot_dimension_numbers<[1], [0], [0], [1], [0, 0, 1, 1], [], []>} : vector<2x32xf32>, vector<32x128xf32>, vector<2x128xf32> -> vector<2x128xf32>
    %c0_9 = arith.constant 0 : index
    %c0_10 = arith.constant 0 : index
    %10 = vector.load %arg5[%c0_9, %c0_10] : memref<2x128xf32, #tpu.memory_space<vmem>>, vector<2x128xf32>
    tpu.vector_store %arg5[%c0_9, %c0_10], %9 {strides = array<i32>} : memref<2x128xf32, #tpu.memory_space<vmem>>, vector<2x128xf32>,
    return
  }
  func.func @transform_0(%arg0: i32) -> (i32, i32) {
    %c0_i32 = arith.constant 0 : i32
    %c0_i32_0 = arith.constant 0 : i32
    return %arg0, %c0_i32 : i32, i32
  }
  func.func @transform_1(%arg0: i32) -> (i32, i32) {
    %c0_i32 = arith.constant 0 : i32
    %c0_i32_0 = arith.constant 0 : i32
    %c0_i32_1 = arith.constant 0 : i32
    return %c0_i32, %c0_i32_0 : i32, i32
  }
  func.func @transform_2(%arg0: i32) -> (i32, i32) {
    %c0_i32 = arith.constant 0 : i32
    %c0_i32_0 = arith.constant 0 : i32
    %c0_i32_1 = arith.constant 0 : i32
    return %c0_i32, %c0_i32_0 : i32, i32
  }
  func.func @transform_3(%arg0: i32) -> (i32, i32) {
    %c0_i32 = arith.constant 0 : i32
    %c0_i32_0 = arith.constant 0 : i32
    %c0_i32_1 = arith.constant 0 : i32
    return %c0_i32, %c0_i32_0 : i32, i32
  }
  func.func @transform_4(%arg0: i32) -> (i32, i32) {
    %c0_i32 = arith.constant 0 : i32
    %c0_i32_0 = arith.constant 0 : i32
    return %arg0, %c0_i32 : i32, i32
  }
}

</mosaic_0001>

<bundles_post_ra>
// kernel: mnist_cnn_forward.3
= control target key start
LH: loop header
LB: loop body
LE: loop exit
PB: predicated region body
PF: predicated region fallthrough
CT: control target
= control target key end

     0   :  { %vm277_vm0 = vcmask 1043456   ;;  %vm278_vm1 = vcmask 1044480   ;;  %v829_v0 = vmov 0.0   ;;  %v830_v2 = vmov 65535   ;;  %s1208_s1 = inlined_call_operand.vmem [shape: bf16[9,128], index: 1, kind: input, shape index: {}]   ;;  %s1209_s0 = inlined_call_operand.vmem [shape: bf16[392,9], index: 0, kind: input, shape index: {}]   ;;  %s1210_s2 = inlined_call_operand.vmem [shape: f32[1,128], index: 2, kind: input, shape index: {}]   ;;  %s1211_s3 = inlined_call_operand.vmem [shape: f32[392,128], index: 3, kind: output, shape index: {}]  }
   0x1   :  { %696 = vmatprep.subr.bf16.mxu0 %v829_v0  ;;  %v803_v1 = vld [vmem:[%s1208_s1] sm:$0x1f]   ;;  %798 = vmatprep.subr.bf16.mxu1 %v829_v0  ;;  %v279_v3 = vsel %vm277_vm0, 4294967295, %v830_v2  ;;  %vm831_vm2 = vmmov 0   ;;  %v805_v7 = vld [vmem:[%s1209_s0 + $0x68] sm:$0xff]   ;;  %vm201_vm3 = vcmask 72704  }
   0x2   :  { %v280_v4 = vsel %vm278_vm1, %v279_v3, 0  ;;  %698 = vmatprep.mubr.msk.bf16.mxu0 %vm831_vm2, %v829_v0  ;;  %v804_v5 = vld [vmem:[%s1209_s0] sm:$0xff]   ;;  %750 = vmatprep.mubr.msk.bf16.mxu1 %vm831_vm2, %v829_v0  ;;  %v806_v8 = vld [vmem:[%s1209_s0 + $0x8] sm:$0xff]   ;;  %v807_v9 = vld [vmem:[%s1209_s0 + $0x70] sm:$0xff]  }
   0x3   :  { %v282_v6 = vand.u32 %v803_v1, %v280_v4  ;;  %v808_v10 = vld [vmem:[%s1209_s0 + $0x10] sm:$0xff]   ;;  %v809_v11 = vld [vmem:[%s1209_s0 + $0x78] sm:$0xff]   ;;  %v811_v13 = vld [vmem:[%s1209_s0 + $0x80] sm:$0xff]  }
   0x4   :  { %v810_v12 = vld [vmem:[%s1209_s0 + $0x18] sm:$0xff]   ;;  %v812_v14 = vld [vmem:[%s1209_s0 + $0x20] sm:$0xff]   ;;  %v813_v15 = vld [vmem:[%s1209_s0 + $0x88] sm:$0xff]  }
   0x5   :  { %697 = vmatpush3.bf16.msra.mxu0 %v282_v6  ;;  %799 = vmatpush3.bf16.msra.mxu1 %v282_v6  ;;  %v814_v16 = vld [vmem:[%s1209_s0 + $0x28] sm:$0xff]   ;;  %v815_v17 = vld [vmem:[%s1209_s0 + $0x90] sm:$0xff]   ;;  %v817_v19 = vld [vmem:[%s1209_s0 + $0x98] sm:$0xff]  }
   0x6   :  { %v816_v18 = vld [vmem:[%s1209_s0 + $0x30] sm:$0xff]   ;;  %v818_v20 = vld [vmem:[%s1209_s0 + $0x38] sm:$0xff]   ;;  %v819_v21 = vld [vmem:[%s1209_s0 + $0xa0] sm:$0xff]  }
   0x7   :  { %v820_v22 = vld [vmem:[%s1209_s0 + $0x40] sm:$0xff]   ;;  %v821_v23 = vld [vmem:[%s1209_s0 + $0xa8] sm:$0xff]   ;;  %v823_v25 = vld [vmem:[%s1209_s0 + $0xb0] sm:$0xff]  }
   0x8   :  { %699 = vmatmul.mubr.msk.bf16.vlgmr.msra.gmra.mrb[0].mxu0 %vm201_vm3, %v804_v5  ;;  %751 = vmatmul.mubr.msk.bf16.vlgmr.msra.gmra.mrb[0].mxu1 %vm201_vm3, %v805_v7  ;;  %v822_v24 = vld [vmem:[%s1209_s0 + $0x48] sm:$0xff]   ;;  %v824_v26 = vld [vmem:[%s1209_s0 + $0x50] sm:$0xff]   ;;  %v825_v27 = vld [vmem:[%s1209_s0 + $0xb8] sm:$0xff]  }
   0x9   :  { %702 = vmatprep.mubr.msk.bf16.mxu0 %vm831_vm2, %v829_v0  ;;  %754 = vmatprep.mubr.msk.bf16.mxu1 %vm831_vm2, %v829_v0  ;;  %v826_v28 = vld [vmem:[%s1209_s0 + $0x58] sm:$0xff]   ;;  %v827_v29 = vld [vmem:[%s1209_s0 + $0xc0] ss:$0 sps:$4 sm:$0xff]  }
   0xa   :  { %v828_v30 = vld [vmem:[%s1209_s0 + $0x60] sm:$0xff]  }
   0xb   :  { %v1010_v31 = vld [vmem:[%s1210_s2] ss:$0 sm:$0xff] }
  0x10   :  { %703 = vmatmul.mubr.msk.bf16.gmra.mrb[4].mxu0 %vm201_vm3, %v806_v8  ;;  %755 = vmatmul.mubr.msk.bf16.gmra.mrb[4].mxu1 %vm201_vm3, %v807_v9 }
  0x11   :  { %706 = vmatprep.mubr.msk.bf16.mxu0 %vm831_vm2, %v829_v0  ;;  %758 = vmatprep.mubr.msk.bf16.mxu1 %vm831_vm2, %v829_v0 }
  0x18   :  { %707 = vmatmul.mubr.msk.bf16.gmra.mrb[8].mxu0 %vm201_vm3, %v808_v10  ;;  %759 = vmatmul.mubr.msk.bf16.gmra.mrb[8].mxu1 %vm201_vm3, %v809_v11 }
  0x19   :  { %710 = vmatprep.mubr.msk.bf16.mxu0 %vm831_vm2, %v829_v0  ;;  %762 = vmatprep.mubr.msk.bf16.mxu1 %vm831_vm2, %v829_v0 }
  0x20   :  { %711 = vmatmul.mubr.msk.bf16.gmra.mrb[12].mxu0 %vm201_vm3, %v810_v12  ;;  %763 = vmatmul.mubr.msk.bf16.gmra.mrb[12].mxu1 %vm201_vm3, %v811_v13 }
  0x21   :  { %714 = vmatprep.mubr.msk.bf16.mxu0 %vm831_vm2, %v829_v0  ;;  %766 = vmatprep.mubr.msk.bf16.mxu1 %vm831_vm2, %v829_v0 }
  0x28   :  { %715 = vmatmul.mubr.msk.bf16.gmra.mrb[16].mxu0 %vm201_vm3, %v812_v14  ;;  %767 = vmatmul.mubr.msk.bf16.gmra.mrb[16].mxu1 %vm201_vm3, %v813_v15 }
  0x29   :  { %718 = vmatprep.mubr.msk.bf16.mxu0 %vm831_vm2, %v829_v0  ;;  %770 = vmatprep.mubr.msk.bf16.mxu1 %vm831_vm2, %v829_v0 }
  0x30   :  { %719 = vmatmul.mubr.msk.bf16.gmra.mrb[20].mxu0 %vm201_vm3, %v814_v16  ;;  %771 = vmatmul.mubr.msk.bf16.gmra.mrb[20].mxu1 %vm201_vm3, %v815_v17 }
  0x31   :  { %722 = vmatprep.mubr.msk.bf16.mxu0 %vm831_vm2, %v829_v0  ;;  %774 = vmatprep.mubr.msk.bf16.mxu1 %vm831_vm2, %v829_v0 }
  0x38   :  { %723 = vmatmul.mubr.msk.bf16.gmra.mrb[24].mxu0 %vm201_vm3, %v816_v18  ;;  %775 = vmatmul.mubr.msk.bf16.gmra.mrb[24].mxu1 %vm201_vm3, %v817_v19 }
  0x39   :  { %726 = vmatprep.mubr.msk.bf16.mxu0 %vm831_vm2, %v829_v0  ;;  %778 = vmatprep.mubr.msk.bf16.mxu1 %vm831_vm2, %v829_v0 }
  0x40   :  { %727 = vmatmul.mubr.msk.bf16.gmra.mrb[28].mxu0 %vm201_vm3, %v818_v20  ;;  %779 = vmatmul.mubr.msk.bf16.gmra.mrb[28].mxu1 %vm201_vm3, %v819_v21 }
  0x41   :  { %730 = vmatprep.mubr.msk.bf16.mxu0 %vm831_vm2, %v829_v0  ;;  %782 = vmatprep.mubr.msk.bf16.mxu1 %vm831_vm2, %v829_v0 }
  0x48   :  { %731 = vmatmul.mubr.msk.bf16.gmra.mrb[32].mxu0 %vm201_vm3, %v820_v22  ;;  %783 = vmatmul.mubr.msk.bf16.gmra.mrb[32].mxu1 %vm201_vm3, %v821_v23 }
  0x49   :  { %734 = vmatprep.mubr.msk.bf16.mxu0 %vm831_vm2, %v829_v0  ;;  %786 = vmatprep.mubr.msk.bf16.mxu1 %vm831_vm2, %v829_v0 }
  0x50   :  { %735 = vmatmul.mubr.msk.bf16.gmra.mrb[36].mxu0 %vm201_vm3, %v822_v24  ;;  %787 = vmatmul.mubr.msk.bf16.gmra.mrb[36].mxu1 %vm201_vm3, %v823_v25 }
  0x51   :  { %738 = vmatprep.mubr.msk.bf16.mxu0 %vm831_vm2, %v829_v0  ;;  %790 = vmatprep.mubr.msk.bf16.mxu1 %vm831_vm2, %v829_v0 }
  0x58   :  { %739 = vmatmul.mubr.msk.bf16.gmra.mrb[40].mxu0 %vm201_vm3, %v824_v26  ;;  %791 = vmatmul.mubr.msk.bf16.gmra.mrb[40].mxu1 %vm201_vm3, %v825_v27 }
  0x59   :  { %742 = vmatprep.mubr.msk.bf16.mxu0 %vm831_vm2, %v829_v0  ;;  %794 = vmatprep.mubr.msk.bf16.mxu1 %vm831_vm2, %v829_v0 }
  0x60   :  { %743 = vmatmul.mubr.msk.bf16.gmra.mrb[44].mxu0 %vm201_vm3, %v826_v28  ;;  %795 = vmatmul.mubr.msk.bf16.gmra.mrb[44].mxu1 %vm201_vm3, %v827_v29 }
  0x61   :  { %746 = vmatprep.mubr.msk.bf16.mxu0 %vm831_vm2, %v829_v0 }
  0x68   :  { %747 = vmatmul.mubr.msk.bf16.gmra.mrb[48].mxu0 %vm201_vm3, %v828_v30 }
  0xdb   :  { %v318_v32 = vpop.f32.mrb[0].mxu0  ;;  %v422_v33 = vpop.f32.mrb[0].mxu1 }
  0xdc   :  { %v319_v34 = vadd.f32 %v1010_v31, %v318_v32  ;;  %v700_v35 = vpop.f32.mrb[1].mxu0  ;;  %v423_v36 = vadd.f32 %v1010_v31, %v422_v33  ;;  %v752_v37 = vpop.f32.mrb[1].mxu1 }
  0xdd   :  { %v321_v38 = vpop.f32.mrb[2].mxu0  ;;  %v425_v39 = vpop.f32.mrb[2].mxu1 }
  0xde   :  { %v516_v40 = vmax.f32 %v319_v34, 0.0  ;;  %v322_v41 = vadd.f32 %v1010_v31, %v321_v38  ;;  %v701_v42 = vpop.f32.mrb[3].mxu0  ;;  %v542_v43 = vmax.f32 %v423_v36, 0.0  ;;  %v426_v44 = vadd.f32 %v1010_v31, %v425_v39  ;;  %v753_v45 = vpop.f32.mrb[3].mxu1 }
  0xe0   :  { %565 = vst [vmem:[%s1211_s3] sm:$0xff] %v516_v40  ;;  %v517_v46 = vmax.f32 %v322_v41, 0.0  ;;  %591 = vst [vmem:[%s1211_s3 + $0xd0] sm:$0xff] %v542_v43  ;;  %v543_v47 = vmax.f32 %v426_v44, 0.0 }
  0xe2   :  { %566 = vst [vmem:[%s1211_s3 + $0x8] sm:$0xff] %v517_v46  ;;  %592 = vst [vmem:[%s1211_s3 + $0xd8] sm:$0xff] %v543_v47 }
  0xe3   :  { %v326_v48 = vpop.f32.mrb[4].mxu0  ;;  %v430_v49 = vpop.f32.mrb[4].mxu1 }
  0xe4   :  { %v327_v50 = vadd.f32 %v1010_v31, %v326_v48  ;;  %v704_v51 = vpop.f32.mrb[5].mxu0  ;;  %v431_v52 = vadd.f32 %v1010_v31, %v430_v49  ;;  %v756_v53 = vpop.f32.mrb[5].mxu1 }
  0xe5   :  { %v329_v54 = vpop.f32.mrb[6].mxu0  ;;  %v433_v55 = vpop.f32.mrb[6].mxu1 }
  0xe6   :  { %v518_v56 = vmax.f32 %v327_v50, 0.0  ;;  %v330_v57 = vadd.f32 %v1010_v31, %v329_v54  ;;  %v705_v58 = vpop.f32.mrb[7].mxu0  ;;  %v544_v59 = vmax.f32 %v431_v52, 0.0  ;;  %v434_v60 = vadd.f32 %v1010_v31, %v433_v55  ;;  %v757_v61 = vpop.f32.mrb[7].mxu1 }
  0xe8   :  { %567 = vst [vmem:[%s1211_s3 + $0x10] sm:$0xff] %v518_v56  ;;  %v519_v62 = vmax.f32 %v330_v57, 0.0  ;;  %593 = vst [vmem:[%s1211_s3 + $0xe0] sm:$0xff] %v544_v59  ;;  %v545_v63 = vmax.f32 %v434_v60, 0.0 }
  0xea   :  { %568 = vst [vmem:[%s1211_s3 + $0x18] sm:$0xff] %v519_v62  ;;  %594 = vst [vmem:[%s1211_s3 + $0xe8] sm:$0xff] %v545_v63 }
  0xeb   :  { %v334_v0 = vpop.f32.mrb[8].mxu0  ;;  %v438_v1 = vpop.f32.mrb[8].mxu1 }
  0xec   :  { %v335_v2 = vadd.f32 %v1010_v31, %v334_v0  ;;  %v708_v3 = vpop.f32.mrb[9].mxu0  ;;  %v439_v4 = vadd.f32 %v1010_v31, %v438_v1  ;;  %v760_v5 = vpop.f32.mrb[9].mxu1 }
  0xed   :  { %v337_v6 = vpop.f32.mrb[10].mxu0  ;;  %v441_v7 = vpop.f32.mrb[10].mxu1 }
  0xee   :  { %v520_v8 = vmax.f32 %v335_v2, 0.0  ;;  %v338_v9 = vadd.f32 %v1010_v31, %v337_v6  ;;  %v709_v10 = vpop.f32.mrb[11].mxu0  ;;  %v546_v11 = vmax.f32 %v439_v4, 0.0  ;;  %v442_v12 = vadd.f32 %v1010_v31, %v441_v7  ;;  %v761_v13 = vpop.f32.mrb[11].mxu1 }
  0xf0   :  { %569 = vst [vmem:[%s1211_s3 + $0x20] sm:$0xff] %v520_v8  ;;  %v521_v14 = vmax.f32 %v338_v9, 0.0  ;;  %595 = vst [vmem:[%s1211_s3 + $0xf0] sm:$0xff] %v546_v11  ;;  %v547_v15 = vmax.f32 %v442_v12, 0.0 }
  0xf2   :  { %570 = vst [vmem:[%s1211_s3 + $0x28] sm:$0xff] %v521_v14  ;;  %596 = vst [vmem:[%s1211_s3 + $0xf8] sm:$0xff] %v547_v15 }
  0xf3   :  { %v342_v16 = vpop.f32.mrb[12].mxu0  ;;  %v446_v17 = vpop.f32.mrb[12].mxu1 }
  0xf4   :  { %v343_v18 = vadd.f32 %v1010_v31, %v342_v16  ;;  %v712_v19 = vpop.f32.mrb[13].mxu0  ;;  %v447_v20 = vadd.f32 %v1010_v31, %v446_v17  ;;  %v764_v21 = vpop.f32.mrb[13].mxu1 }
  0xf5   :  { %v345_v22 = vpop.f32.mrb[14].mxu0  ;;  %v449_v23 = vpop.f32.mrb[14].mxu1 }
  0xf6   :  { %v522_v24 = vmax.f32 %v343_v18, 0.0  ;;  %v346_v25 = vadd.f32 %v1010_v31, %v345_v22  ;;  %v713_v26 = vpop.f32.mrb[15].mxu0  ;;  %v548_v27 = vmax.f32 %v447_v20, 0.0  ;;  %v450_v28 = vadd.f32 %v1010_v31, %v449_v23  ;;  %v765_v29 = vpop.f32.mrb[15].mxu1 }
  0xf8   :  { %571 = vst [vmem:[%s1211_s3 + $0x30] sm:$0xff] %v522_v24  ;;  %v523_v30 = vmax.f32 %v346_v25, 0.0  ;;  %597 = vst [vmem:[%s1211_s3 + $0x100] sm:$0xff] %v548_v27  ;;  %v549_v32 = vmax.f32 %v450_v28, 0.0 }
  0xfa   :  { %572 = vst [vmem:[%s1211_s3 + $0x38] sm:$0xff] %v523_v30  ;;  %598 = vst [vmem:[%s1211_s3 + $0x108] sm:$0xff] %v549_v32 }
  0xfb   :  { %v350_v33 = vpop.f32.mrb[16].mxu0  ;;  %v454_v34 = vpop.f32.mrb[16].mxu1 }
  0xfc   :  { %v351_v35 = vadd.f32 %v1010_v31, %v350_v33  ;;  %v716_v36 = vpop.f32.mrb[17].mxu0  ;;  %v455_v37 = vadd.f32 %v1010_v31, %v454_v34  ;;  %v768_v38 = vpop.f32.mrb[17].mxu1 }
  0xfd   :  { %v353_v39 = vpop.f32.mrb[18].mxu0  ;;  %v457_v40 = vpop.f32.mrb[18].mxu1 }
  0xfe   :  { %v524_v41 = vmax.f32 %v351_v35, 0.0  ;;  %v354_v42 = vadd.f32 %v1010_v31, %v353_v39  ;;  %v717_v43 = vpop.f32.mrb[19].mxu0  ;;  %v550_v44 = vmax.f32 %v455_v37, 0.0  ;;  %v458_v45 = vadd.f32 %v1010_v31, %v457_v40  ;;  %v769_v46 = vpop.f32.mrb[19].mxu1 }
 0x100   :  { %573 = vst [vmem:[%s1211_s3 + $0x40] sm:$0xff] %v524_v41  ;;  %v525_v47 = vmax.f32 %v354_v42, 0.0  ;;  %599 = vst [vmem:[%s1211_s3 + $0x110] sm:$0xff] %v550_v44  ;;  %v551_v48 = vmax.f32 %v458_v45, 0.0 }
 0x102   :  { %574 = vst [vmem:[%s1211_s3 + $0x48] sm:$0xff] %v525_v47  ;;  %600 = vst [vmem:[%s1211_s3 + $0x118] sm:$0xff] %v551_v48 }
 0x103   :  { %v358_v49 = vpop.f32.mrb[20].mxu0  ;;  %v462_v50 = vpop.f32.mrb[20].mxu1 }
 0x104   :  { %v359_v51 = vadd.f32 %v1010_v31, %v358_v49  ;;  %v720_v52 = vpop.f32.mrb[21].mxu0  ;;  %v463_v53 = vadd.f32 %v1010_v31, %v462_v50  ;;  %v772_v54 = vpop.f32.mrb[21].mxu1 }
 0x105   :  { %v361_v55 = vpop.f32.mrb[22].mxu0  ;;  %v465_v56 = vpop.f32.mrb[22].mxu1 }
 0x106   :  { %v526_v57 = vmax.f32 %v359_v51, 0.0  ;;  %v362_v58 = vadd.f32 %v1010_v31, %v361_v55  ;;  %v721_v59 = vpop.f32.mrb[23].mxu0  ;;  %v552_v60 = vmax.f32 %v463_v53, 0.0  ;;  %v466_v61 = vadd.f32 %v1010_v31, %v465_v56  ;;  %v773_v62 = vpop.f32.mrb[23].mxu1 }
 0x108   :  { %575 = vst [vmem:[%s1211_s3 + $0x50] sm:$0xff] %v526_v57  ;;  %v527_v63 = vmax.f32 %v362_v58, 0.0  ;;  %601 = vst [vmem:[%s1211_s3 + $0x120] sm:$0xff] %v552_v60  ;;  %v553_v0 = vmax.f32 %v466_v61, 0.0 }
 0x10a   :  { %576 = vst [vmem:[%s1211_s3 + $0x58] sm:$0xff] %v527_v63  ;;  %602 = vst [vmem:[%s1211_s3 + $0x128] sm:$0xff] %v553_v0 }
 0x10b   :  { %v366_v1 = vpop.f32.mrb[24].mxu0  ;;  %v470_v2 = vpop.f32.mrb[24].mxu1 }
 0x10c   :  { %v367_v3 = vadd.f32 %v1010_v31, %v366_v1  ;;  %v724_v4 = vpop.f32.mrb[25].mxu0  ;;  %v471_v5 = vadd.f32 %v1010_v31, %v470_v2  ;;  %v776_v6 = vpop.f32.mrb[25].mxu1 }
 0x10d   :  { %v369_v7 = vpop.f32.mrb[26].mxu0  ;;  %v473_v8 = vpop.f32.mrb[26].mxu1 }
 0x10e   :  { %v528_v9 = vmax.f32 %v367_v3, 0.0  ;;  %v370_v10 = vadd.f32 %v1010_v31, %v369_v7  ;;  %v725_v11 = vpop.f32.mrb[27].mxu0  ;;  %v554_v12 = vmax.f32 %v471_v5, 0.0  ;;  %v474_v13 = vadd.f32 %v1010_v31, %v473_v8  ;;  %v777_v14 = vpop.f32.mrb[27].mxu1 }
 0x110   :  { %577 = vst [vmem:[%s1211_s3 + $0x60] sm:$0xff] %v528_v9  ;;  %v529_v15 = vmax.f32 %v370_v10, 0.0  ;;  %603 = vst [vmem:[%s1211_s3 + $0x130] sm:$0xff] %v554_v12  ;;  %v555_v16 = vmax.f32 %v474_v13, 0.0 }
 0x112   :  { %578 = vst [vmem:[%s1211_s3 + $0x68] sm:$0xff] %v529_v15  ;;  %604 = vst [vmem:[%s1211_s3 + $0x138] sm:$0xff] %v555_v16 }
 0x113   :  { %v374_v17 = vpop.f32.mrb[28].mxu0  ;;  %v478_v18 = vpop.f32.mrb[28].mxu1 }
 0x114   :  { %v375_v19 = vadd.f32 %v1010_v31, %v374_v17  ;;  %v728_v20 = vpop.f32.mrb[29].mxu0  ;;  %v479_v21 = vadd.f32 %v1010_v31, %v478_v18  ;;  %v780_v22 = vpop.f32.mrb[29].mxu1 }
 0x115   :  { %v377_v23 = vpop.f32.mrb[30].mxu0  ;;  %v481_v24 = vpop.f32.mrb[30].mxu1 }
 0x116   :  { %v530_v25 = vmax.f32 %v375_v19, 0.0  ;;  %v378_v26 = vadd.f32 %v1010_v31, %v377_v23  ;;  %v729_v27 = vpop.f32.mrb[31].mxu0  ;;  %v556_v28 = vmax.f32 %v479_v21, 0.0  ;;  %v482_v29 = vadd.f32 %v1010_v31, %v481_v24  ;;  %v781_v30 = vpop.f32.mrb[31].mxu1 }
 0x118   :  { %579 = vst [vmem:[%s1211_s3 + $0x70] sm:$0xff] %v530_v25  ;;  %v531_v32 = vmax.f32 %v378_v26, 0.0  ;;  %605 = vst [vmem:[%s1211_s3 + $0x140] sm:$0xff] %v556_v28  ;;  %v557_v33 = vmax.f32 %v482_v29, 0.0 }
 0x11a   :  { %580 = vst [vmem:[%s1211_s3 + $0x78] sm:$0xff] %v531_v32  ;;  %606 = vst [vmem:[%s1211_s3 + $0x148] sm:$0xff] %v557_v33 }
 0x11b   :  { %v382_v34 = vpop.f32.mrb[32].mxu0  ;;  %v486_v35 = vpop.f32.mrb[32].mxu1 }
 0x11c   :  { %v383_v36 = vadd.f32 %v1010_v31, %v382_v34  ;;  %v732_v37 = vpop.f32.mrb[33].mxu0  ;;  %v487_v38 = vadd.f32 %v1010_v31, %v486_v35  ;;  %v784_v39 = vpop.f32.mrb[33].mxu1 }
 0x11d   :  { %v385_v40 = vpop.f32.mrb[34].mxu0  ;;  %v489_v41 = vpop.f32.mrb[34].mxu1 }
 0x11e   :  { %v532_v42 = vmax.f32 %v383_v36, 0.0  ;;  %v386_v43 = vadd.f32 %v1010_v31, %v385_v40  ;;  %v733_v44 = vpop.f32.mrb[35].mxu0  ;;  %v558_v45 = vmax.f32 %v487_v38, 0.0  ;;  %v490_v46 = vadd.f32 %v1010_v31, %v489_v41  ;;  %v785_v47 = vpop.f32.mrb[35].mxu1 }
 0x120   :  { %581 = vst [vmem:[%s1211_s3 + $0x80] sm:$0xff] %v532_v42  ;;  %v533_v48 = vmax.f32 %v386_v43, 0.0  ;;  %607 = vst [vmem:[%s1211_s3 + $0x150] sm:$0xff] %v558_v45  ;;  %v559_v49 = vmax.f32 %v490_v46, 0.0 }
 0x122   :  { %582 = vst [vmem:[%s1211_s3 + $0x88] sm:$0xff] %v533_v48  ;;  %608 = vst [vmem:[%s1211_s3 + $0x158] sm:$0xff] %v559_v49 }
 0x123   :  { %v390_v50 = vpop.f32.mrb[36].mxu0  ;;  %v494_v51 = vpop.f32.mrb[36].mxu1 }
 0x124   :  { %v391_v52 = vadd.f32 %v1010_v31, %v390_v50  ;;  %v736_v53 = vpop.f32.mrb[37].mxu0  ;;  %v495_v54 = vadd.f32 %v1010_v31, %v494_v51  ;;  %v788_v55 = vpop.f32.mrb[37].mxu1 }
 0x125   :  { %v393_v56 = vpop.f32.mrb[38].mxu0  ;;  %v497_v57 = vpop.f32.mrb[38].mxu1 }
 0x126   :  { %v534_v58 = vmax.f32 %v391_v52, 0.0  ;;  %v394_v59 = vadd.f32 %v1010_v31, %v393_v56  ;;  %v737_v60 = vpop.f32.mrb[39].mxu0  ;;  %v560_v61 = vmax.f32 %v495_v54, 0.0  ;;  %v498_v62 = vadd.f32 %v1010_v31, %v497_v57  ;;  %v789_v63 = vpop.f32.mrb[39].mxu1 }
 0x128   :  { %583 = vst [vmem:[%s1211_s3 + $0x90] sm:$0xff] %v534_v58  ;;  %v535_v0 = vmax.f32 %v394_v59, 0.0  ;;  %609 = vst [vmem:[%s1211_s3 + $0x160] sm:$0xff] %v560_v61  ;;  %v561_v1 = vmax.f32 %v498_v62, 0.0 }
 0x12a   :  { %584 = vst [vmem:[%s1211_s3 + $0x98] sm:$0xff] %v535_v0  ;;  %610 = vst [vmem:[%s1211_s3 + $0x168] sm:$0xff] %v561_v1 }
 0x12b   :  { %v398_v2 = vpop.f32.mrb[40].mxu0  ;;  %v502_v3 = vpop.f32.mrb[40].mxu1 }
 0x12c   :  { %v399_v4 = vadd.f32 %v1010_v31, %v398_v2  ;;  %v740_v5 = vpop.f32.mrb[41].mxu0  ;;  %v503_v6 = vadd.f32 %v1010_v31, %v502_v3  ;;  %v792_v7 = vpop.f32.mrb[41].mxu1 }
 0x12d   :  { %v401_v8 = vpop.f32.mrb[42].mxu0  ;;  %v505_v9 = vpop.f32.mrb[42].mxu1 }
 0x12e   :  { %v536_v10 = vmax.f32 %v399_v4, 0.0  ;;  %v402_v11 = vadd.f32 %v1010_v31, %v401_v8  ;;  %v741_v12 = vpop.f32.mrb[43].mxu0  ;;  %v562_v13 = vmax.f32 %v503_v6, 0.0  ;;  %v506_v14 = vadd.f32 %v1010_v31, %v505_v9  ;;  %v793_v15 = vpop.f32.mrb[43].mxu1 }
 0x130   :  { %585 = vst [vmem:[%s1211_s3 + $0xa0] sm:$0xff] %v536_v10  ;;  %v537_v16 = vmax.f32 %v402_v11, 0.0  ;;  %611 = vst [vmem:[%s1211_s3 + $0x170] sm:$0xff] %v562_v13  ;;  %v563_v17 = vmax.f32 %v506_v14, 0.0 }
 0x132   :  { %586 = vst [vmem:[%s1211_s3 + $0xa8] sm:$0xff] %v537_v16  ;;  %612 = vst [vmem:[%s1211_s3 + $0x178] sm:$0xff] %v563_v17 }
 0x133   :  { %v406_v18 = vpop.f32.mrb[44].mxu0  ;;  %v510_v19 = vpop.f32.mrb[44].mxu1 }
 0x134   :  { %v407_v20 = vadd.f32 %v1010_v31, %v406_v18  ;;  %v744_v21 = vpop.f32.mrb[45].mxu0  ;;  %v511_v22 = vadd.f32 %v1010_v31, %v510_v19  ;;  %v796_v23 = vpop.f32.mrb[45].mxu1 }
 0x135   :  { %v409_v24 = vpop.f32.mrb[46].mxu0  ;;  %v513_v25 = vpop.f32.mrb[46].mxu1 }
 0x136   :  { %v538_v26 = vmax.f32 %v407_v20, 0.0  ;;  %v410_v27 = vadd.f32 %v1010_v31, %v409_v24  ;;  %v745_v28 = vpop.f32.mrb[47].mxu0  ;;  %v564_v29 = vmax.f32 %v511_v22, 0.0  ;;  %v797_v30 = vpop.f32.mrb[47].mxu1 }
 0x138   :  { %587 = vst [vmem:[%s1211_s3 + $0xb0] sm:$0xff] %v538_v26  ;;  %v539_v32 = vmax.f32 %v410_v27, 0.0  ;;  %613 = vst [vmem:[%s1211_s3 + $0x180] sm:$0xff] %v564_v29 }
 0x13a   :  { %588 = vst [vmem:[%s1211_s3 + $0xb8] sm:$0xff] %v539_v32 }
 0x13b   :  { %v414_v33 = vpop.f32.mrb[48].mxu0 }
 0x13c   :  { %v415_v34 = vadd.f32 %v1010_v31, %v414_v33  ;;  %v748_v35 = vpop.f32.mrb[49].mxu0 }
 0x13d   :  { %v417_v36 = vpop.f32.mrb[50].mxu0 }
 0x13e   :  { %v540_v37 = vmax.f32 %v415_v34, 0.0  ;;  %v418_v38 = vadd.f32 %v1010_v31, %v417_v36  ;;  %v749_v39 = vpop.f32.mrb[51].mxu0 }
 0x140   :  { %589 = vst [vmem:[%s1211_s3 + $0xc0] sm:$0xff] %v540_v37  ;;  %v541_v40 = vmax.f32 %v418_v38, 0.0 }
 0x142   :  { %590 = vst [vmem:[%s1211_s3 + $0xc8] sm:$0xff] %v541_v40 }

// kernel: mnist_cnn_forward.4
= control target key start
LH: loop header
LB: loop body
LE: loop exit
PB: predicated region body
PF: predicated region fallthrough
CT: control target
= control target key end

     0   :  { %v386_v0 = vmov 0   ;;  %vm167_vm0 = vcmask 130048   ;;  %s537_s1 = inlined_call_operand.vmem [shape: bf16[144,128], index: 1, kind: input, shape index: {}]   ;;  %s538_s0 = inlined_call_operand.vmem [shape: bf16[104,144], index: 0, kind: input, shape index: {}]   ;;  %s539_s2 = inlined_call_operand.vmem [shape: f32[1,128], index: 2, kind: input, shape index: {}]   ;;  %s540_s3 = inlined_call_operand.vmem [shape: f32[104,128], index: 3, kind: output, shape index: {}]  }
   0x1   :  { %189 = vmatprep.subr.bf16.mxu0 %v386_v0  ;;  %v357_v1 = vld [vmem:[%s537_s1] sm:$0xff]   ;;  %338 = vmatprep.subr.bf16.mxu1 %v386_v0  ;;  %v358_v2 = vld [vmem:[%s537_s1 + $0x8] sm:$0xff]   ;;  %v359_v3 = vld [vmem:[%s537_s1 + $0x10] sm:$0xff]  }
   0x2   :  { %190 = vmatpush1.bf16.msra.mxu0 %v357_v1  ;;  %347 = vmatpush1.bf16.msra.mxu1 %v357_v1  ;;  %v360_v4 = vld [vmem:[%s537_s1 + $0x18] sm:$0xff]   ;;  %v368_v5 = vld [vmem:[%s538_s0 + $0x4] ss:$8 sps:$4 sm:$0xff]   ;;  %v363_v9 = vld [vmem:[%s537_s1 + $0x30] sm:$0xff]  }
   0x3   :  { %191 = vmatprep.subr.bf16.mxu0 %v386_v0  ;;  %339 = vmatprep.subr.bf16.mxu1 %v386_v0  ;;  %v371_v6 = vld [vmem:[%s538_s0 + $0x44] ss:$8 sps:$4 sm:$0xff]   ;;  %v364_v10 = vld [vmem:[%s537_s1 + $0x38] sm:$0xff]   ;;  %v366_v12 = vld [vmem:[%s538_s0] ss:$8 sps:$4 sm:$0xff]  }
   0x4   :  { %331 = vmatprep.mubr.msk.bf16.mxu0 %vm167_vm0, %v368_v5  ;;  %335 = vmatprep.mubr.msk.bf16.mxu1 %vm167_vm0, %v371_v6  ;;  %v361_v7 = vld [vmem:[%s537_s1 + $0x20] sm:$0xff]   ;;  %v362_v8 = vld [vmem:[%s537_s1 + $0x28] sm:$0xff]   ;;  %v372_v14 = vld [vmem:[%s538_s0 + $0x14] ss:$8 sps:$4 sm:$0xff]  }
   0x5   :  { %v365_v11 = vld [vmem:[%s537_s1 + $0x40] sm:$0xff]   ;;  %v375_v15 = vld [vmem:[%s538_s0 + $0x54] ss:$8 sps:$4 sm:$0xff]   ;;  %v374_v17 = vld [vmem:[%s538_s0 + $0x10] ss:$8 sps:$4 sm:$0xff]  }
   0x6   :  { %192 = vmatpush1.bf16.msra.mxu0 %v358_v2  ;;  %348 = vmatpush1.bf16.msra.mxu1 %v358_v2  ;;  %v369_v13 = vld [vmem:[%s538_s0 + $0x40] ss:$8 sps:$4 sm:$0xff]   ;;  %v379_v18 = vld [vmem:[%s538_s0 + $0x50] ss:$8 sps:$4 sm:$0xff]   ;;  %v377_v19 = vld [vmem:[%s538_s0 + $0x24] ss:$8 sps:$4 sm:$0xff]  }
   0x7   :  { %193 = vmatprep.subr.bf16.mxu0 %v386_v0  ;;  %340 = vmatprep.subr.bf16.mxu1 %v386_v0  ;;  %v27_v16 = vld [vmem:[%s538_s0 + $0x60] sm:$0xff]  ;;  %v382_v23 = vld [vmem:[%s538_s0 + $0x34] ss:$8 sps:$4 sm:$0xff]   ;;  %v385_v24 = vld [vmem:[%s538_s0 + $0x30] ss:$8 sps:$4 sm:$0xff]  }
   0x8   :  { %v321_v20 = vcombine.high %v27_v16, %v27_v16  ;;  %v380_v21 = vld [vmem:[%s538_s0 + $0x20] ss:$8 sps:$4 sm:$0xff]   ;;  %v320_v22 = vcombine.low %v27_v16, %v27_v16 }
   0x9   :  { %v483_v25 = vld [vmem:[%s539_s2] ss:$0 sm:$0xff] }
   0xa   :  { %194 = vmatpush1.bf16.msra.mxu0 %v359_v3  ;;  %349 = vmatpush1.bf16.msra.mxu1 %v359_v3 }
   0xb   :  { %195 = vmatprep.subr.bf16.mxu0 %v386_v0  ;;  %341 = vmatprep.subr.bf16.mxu1 %v386_v0 }
   0xe   :  { %196 = vmatpush1.bf16.msra.mxu0 %v360_v4  ;;  %350 = vmatpush1.bf16.msra.mxu1 %v360_v4 }
   0xf   :  { %197 = vmatprep.subr.bf16.mxu0 %v386_v0  ;;  %342 = vmatprep.subr.bf16.mxu1 %v386_v0 }
  0x12   :  { %198 = vmatpush1.bf16.msra.mxu0 %v361_v7  ;;  %351 = vmatpush1.bf16.msra.mxu1 %v361_v7 }
  0x13   :  { %199 = vmatprep.subr.bf16.mxu0 %v386_v0  ;;  %343 = vmatprep.subr.bf16.mxu1 %v386_v0 }
  0x16   :  { %200 = vmatpush1.bf16.msra.mxu0 %v362_v8  ;;  %352 = vmatpush1.bf16.msra.mxu1 %v362_v8 }
  0x17   :  { %201 = vmatprep.subr.bf16.mxu0 %v386_v0  ;;  %344 = vmatprep.subr.bf16.mxu1 %v386_v0 }
  0x1a   :  { %202 = vmatpush1.bf16.msra.mxu0 %v363_v9  ;;  %353 = vmatpush1.bf16.msra.mxu1 %v363_v9 }
  0x1b   :  { %203 = vmatprep.subr.bf16.mxu0 %v386_v0  ;;  %345 = vmatprep.subr.bf16.mxu1 %v386_v0 }
  0x1e   :  { %204 = vmatpush1.bf16.msra.mxu0 %v364_v10  ;;  %354 = vmatpush1.bf16.msra.mxu1 %v364_v10 }
  0x1f   :  { %205 = vmatprep.subr.bf16.mxu0 %v386_v0  ;;  %346 = vmatprep.subr.bf16.mxu1 %v386_v0 }
  0x22   :  { %206 = vmatpush1.bf16.msra.mxu0 %v365_v11  ;;  %355 = vmatpush1.bf16.msra.mxu1 %v365_v11 }
  0x25   :  { %222 = vmatmul.mubr.bf16.vlgmr.msra.gmra.mrb[0].mxu0 %v366_v12  ;;  %254 = vmatmul.mubr.bf16.vlgmr.msra.gmra.mrb[0].mxu1 %v369_v13 }
  0x26   :  { %332 = vmatprep.mubr.msk.bf16.mxu0 %vm167_vm0, %v372_v14  ;;  %336 = vmatprep.mubr.msk.bf16.mxu1 %vm167_vm0, %v375_v15 }
  0x2d   :  { %230 = vmatmul.mubr.bf16.gmra.mrb[4].mxu0 %v374_v17  ;;  %262 = vmatmul.mubr.bf16.gmra.mrb[4].mxu1 %v379_v18 }
  0x2e   :  { %333 = vmatprep.mubr.msk.bf16.mxu0 %vm167_vm0, %v377_v19  ;;  %337 = vmatprep.mubr.msk.bf16.mxu1 %vm167_vm0, %v321_v20 }
  0x35   :  { %238 = vmatmul.mubr.bf16.gmra.mrb[8].mxu0 %v380_v21  ;;  %270 = vmatmul.mubr.bf16.gmra.mrb[8].mxu1 %v320_v22 }
  0x36   :  { %334 = vmatprep.mubr.msk.bf16.mxu0 %vm167_vm0, %v382_v23 }
  0x3d   :  { %246 = vmatmul.mubr.bf16.gmra.mrb[12].mxu0 %v385_v24 }
  0xf8   :  { %v223_v26 = vpop.f32.mrb[0].mxu0  ;;  %v255_v27 = vpop.f32.mrb[0].mxu1 }
  0xf9   :  { %v224_v28 = vadd.f32 %v483_v25, %v223_v26  ;;  %v225_v29 = vpop.f32.mrb[1].mxu0  ;;  %v256_v30 = vadd.f32 %v483_v25, %v255_v27  ;;  %v257_v31 = vpop.f32.mrb[1].mxu1 }
  0xfa   :  { %v226_v32 = vpop.f32.mrb[2].mxu0  ;;  %v258_v33 = vpop.f32.mrb[2].mxu1 }
  0xfb   :  { %v277_v34 = vmax.f32 %v224_v28, 0.0  ;;  %v227_v35 = vadd.f32 %v483_v25, %v226_v32  ;;  %v228_v36 = vpop.f32.mrb[3].mxu0  ;;  %v285_v37 = vmax.f32 %v256_v30, 0.0  ;;  %v259_v38 = vadd.f32 %v483_v25, %v258_v33  ;;  %v260_v39 = vpop.f32.mrb[3].mxu1 }
  0xfd   :  { %290 = vst [vmem:[%s540_s3] sm:$0xff] %v277_v34  ;;  %v278_v40 = vmax.f32 %v227_v35, 0.0  ;;  %298 = vst [vmem:[%s540_s3 + $0x40] sm:$0xff] %v285_v37  ;;  %v286_v41 = vmax.f32 %v259_v38, 0.0 }
  0xff   :  { %291 = vst [vmem:[%s540_s3 + $0x8] sm:$0xff] %v278_v40  ;;  %299 = vst [vmem:[%s540_s3 + $0x48] sm:$0xff] %v286_v41 }
 0x100   :  { %v231_v42 = vpop.f32.mrb[4].mxu0  ;;  %v263_v43 = vpop.f32.mrb[4].mxu1 }
 0x101   :  { %v232_v44 = vadd.f32 %v483_v25, %v231_v42  ;;  %v233_v45 = vpop.f32.mrb[5].mxu0  ;;  %v264_v46 = vadd.f32 %v483_v25, %v263_v43  ;;  %v265_v47 = vpop.f32.mrb[5].mxu1 }
 0x102   :  { %v234_v48 = vpop.f32.mrb[6].mxu0  ;;  %v266_v49 = vpop.f32.mrb[6].mxu1 }
 0x103   :  { %v279_v50 = vmax.f32 %v232_v44, 0.0  ;;  %v235_v51 = vadd.f32 %v483_v25, %v234_v48  ;;  %v236_v52 = vpop.f32.mrb[7].mxu0  ;;  %v287_v53 = vmax.f32 %v264_v46, 0.0  ;;  %v267_v54 = vadd.f32 %v483_v25, %v266_v49  ;;  %v268_v55 = vpop.f32.mrb[7].mxu1 }
 0x105   :  { %292 = vst [vmem:[%s540_s3 + $0x10] sm:$0xff] %v279_v50  ;;  %v280_v56 = vmax.f32 %v235_v51, 0.0  ;;  %300 = vst [vmem:[%s540_s3 + $0x50] sm:$0xff] %v287_v53  ;;  %v288_v57 = vmax.f32 %v267_v54, 0.0 }
 0x107   :  { %293 = vst [vmem:[%s540_s3 + $0x18] sm:$0xff] %v280_v56  ;;  %301 = vst [vmem:[%s540_s3 + $0x58] sm:$0xff] %v288_v57 }
 0x108   :  { %v239_v58 = vpop.f32.mrb[8].mxu0  ;;  %v271_v59 = vpop.f32.mrb[8].mxu1 }
 0x109   :  { %v240_v60 = vadd.f32 %v483_v25, %v239_v58  ;;  %v241_v61 = vpop.f32.mrb[9].mxu0  ;;  %v272_v62 = vadd.f32 %v483_v25, %v271_v59  ;;  %v273_v63 = vpop.f32.mrb[9].mxu1 }
 0x10a   :  { %v242_v0 = vpop.f32.mrb[10].mxu0  ;;  %v274_v1 = vpop.f32.mrb[10].mxu1 }
 0x10b   :  { %v281_v2 = vmax.f32 %v240_v60, 0.0  ;;  %v243_v3 = vadd.f32 %v483_v25, %v242_v0  ;;  %v244_v4 = vpop.f32.mrb[11].mxu0  ;;  %v289_v5 = vmax.f32 %v272_v62, 0.0  ;;  %v275_v6 = vpop.f32.mrb[11].mxu1 }
 0x10d   :  { %294 = vst [vmem:[%s540_s3 + $0x20] sm:$0xff] %v281_v2  ;;  %v282_v7 = vmax.f32 %v243_v3, 0.0  ;;  %302 = vst [vmem:[%s540_s3 + $0x60] sm:$0xff] %v289_v5 }
 0x10f   :  { %295 = vst [vmem:[%s540_s3 + $0x28] sm:$0xff] %v282_v7 }
 0x110   :  { %v247_v8 = vpop.f32.mrb[12].mxu0 }
 0x111   :  { %v248_v9 = vadd.f32 %v483_v25, %v247_v8  ;;  %v249_v10 = vpop.f32.mrb[13].mxu0 }
 0x112   :  { %v250_v11 = vpop.f32.mrb[14].mxu0 }
 0x113   :  { %v283_v12 = vmax.f32 %v248_v9, 0.0  ;;  %v251_v13 = vadd.f32 %v483_v25, %v250_v11  ;;  %v252_v14 = vpop.f32.mrb[15].mxu0 }
 0x115   :  { %296 = vst [vmem:[%s540_s3 + $0x30] sm:$0xff] %v283_v12  ;;  %v284_v15 = vmax.f32 %v251_v13, 0.0 }
 0x117   :  { %297 = vst [vmem:[%s540_s3 + $0x38] sm:$0xff] %v284_v15 }

// kernel: mnist_cnn_forward.5
= control target key start
LH: loop header
LB: loop body
LE: loop exit
PB: predicated region body
PF: predicated region fallthrough
CT: control target
= control target key end

     0   :  { %v371_v1 = vmov 0   ;;  %vm120_vm0 = vcmask 130048   ;;  %s458_s0 = inlined_call_operand.vmem [shape: bf16[32,144], index: 0, kind: input, shape index: {}]   ;;  %s459_s1 = inlined_call_operand.vmem [shape: bf16[144,128], index: 1, kind: input, shape index: {}]   ;;  %s460_s2 = inlined_call_operand.vmem [shape: f32[1,128], index: 2, kind: input, shape index: {}]   ;;  %s461_s3 = inlined_call_operand.vmem [shape: f32[2,32], index: 3, kind: input, shape index: {}]   ;;  %s462_s4 = inlined_call_operand.hbm [shape: f32[2,128], index: 4, kind: output, shape index: {}]  }
   0x1   :  { %v332_v0 = vld [vmem:[%s459_s1] sm:$0xff]   ;;  %127 = vmatprep.subr.bf16.mxu0 %v371_v1  ;;  %309 = vmatprep.subr.bf16.mxu1 %v371_v1  ;;  %v333_v2 = vld [vmem:[%s459_s1 + $0x8] sm:$0xff]   ;;  %v334_v3 = vld [vmem:[%s459_s1 + $0x10] sm:$0xff]  }
   0x2   :  { %128 = vmatpush1.bf16.msra.mxu0 %v332_v0  ;;  %318 = vmatpush1.bf16.msra.mxu1 %v332_v0  ;;  %v335_v4 = vld [vmem:[%s459_s1 + $0x18] sm:$0xff]   ;;  %v343_v5 = vld [vmem:[%s458_s0 + $0x4] ss:$8 sps:$4 sm:$0xff]  }
   0x3   :  { %129 = vmatprep.subr.bf16.mxu0 %v371_v1  ;;  %310 = vmatprep.subr.bf16.mxu1 %v371_v1  ;;  %v346_v6 = vld [vmem:[%s458_s0 + $0x14] ss:$8 sps:$4 sm:$0xff]  }
   0x4   :  { %284 = vmatprep.mubr.msk.bf16.mxu0 %vm120_vm0, %v343_v5 }
   0x6   :  { %130 = vmatpush1.bf16.msra.mxu0 %v333_v2  ;;  %319 = vmatpush1.bf16.msra.mxu1 %v333_v2 }
   0x7   :  { %131 = vmatprep.subr.bf16.mxu0 %v371_v1  ;;  %311 = vmatprep.subr.bf16.mxu1 %v371_v1 }
   0xa   :  { %132 = vmatpush1.bf16.msra.mxu0 %v334_v3  ;;  %320 = vmatpush1.bf16.msra.mxu1 %v334_v3 }
   0xb   :  { %133 = vmatprep.subr.bf16.mxu0 %v371_v1  ;;  %312 = vmatprep.subr.bf16.mxu1 %v371_v1 }
   0xc   :  { %9 = vsyncpa [#allocation3], 0  ;;  %285 = vmatprep.mubr.msk.bf16.mxu1 %vm120_vm0, %v346_v6  ;;  %v336_v7 = vld [vmem:[%s459_s1 + $0x20] sm:$0xff]   ;;  %v337_v8 = vld [vmem:[%s459_s1 + $0x28] sm:$0xff]   ;;  %v372_v14 = vmov 0.0|0.0   ;;  %vm373_vm1 = vmmov 0  }
   0xd   :  { %v338_v9 = vld [vmem:[%s459_s1 + $0x30] sm:$0xff]   ;;  %v339_v10 = vld [vmem:[%s459_s1 + $0x38] sm:$0xff]   ;;  %v340_v11 = vld [vmem:[%s459_s1 + $0x40] sm:$0xff]   ;;  %v374_v15 = vmov 0.0   ;;  %vm181_vm2 = vcmask 261120   ;;  %s375_s16 = smov [#allocation2]  }
   0xe   :  { %134 = vmatpush1.bf16.msra.mxu0 %v335_v4  ;;  %321 = vmatpush1.bf16.msra.mxu1 %v335_v4  ;;  %v341_v12 = vld [vmem:[%s458_s0] ss:$8 sps:$4 sm:$0xff]   ;;  %v344_v13 = vld [vmem:[%s458_s0 + $0x10] ss:$8 sps:$4 sm:$0xff]   ;;  %s262_s17 = sshll.u32 %s375_s16, 4  ;;  %s263_s17 = int_to_ptr.vmem [resolvable:$true] %s262_s17 }
   0xf   :  { %135 = vmatprep.subr.bf16.mxu0 %v371_v1  ;;  %313 = vmatprep.subr.bf16.mxu1 %v371_v1  ;;  %v270_v16 = vld [vmem:[%s460_s2] ss:$0 sm:$0xff]  ;;  %s347_s18 = scalar_lea.vmem %s263_s17, 32  ;;  %p352_p1 = scmp.lt.s32.totalorder %s263_s17, %s263_s17 }
  0x10   :  { %v180_v35 = vld [vmem:[%s461_s3] sm:$0x3]  ;;  %p348_p0 = scmp.ne.s32.totalorder %s263_s17, %s347_s18  ;;  %p353_p2 = scmp.lt.s32.totalorder %s347_s18, %s347_s18 }
  0x12   :  { %136 = vmatpush1.bf16.msra.mxu0 %v336_v7  ;;  %322 = vmatpush1.bf16.msra.mxu1 %v336_v7  ;;  %p354_p3 = por %p353_p2, %p352_p1 }
  0x13   :  { %137 = vmatprep.subr.bf16.mxu0 %v371_v1  ;;  %314 = vmatprep.subr.bf16.mxu1 %v371_v1 }
  0x14   :  { %p355_p4 = pnand %p354_p3, %p348_p0 }
  0x16   :  { %138 = vmatpush1.bf16.msra.mxu0 %v337_v8  ;;  %323 = vmatpush1.bf16.msra.mxu1 %v337_v8 }
  0x17   :  { %139 = vmatprep.subr.bf16.mxu0 %v371_v1  ;;  %315 = vmatprep.subr.bf16.mxu1 %v371_v1 }
  0x1a   :  { %140 = vmatpush1.bf16.msra.mxu0 %v338_v9  ;;  %324 = vmatpush1.bf16.msra.mxu1 %v338_v9 }
  0x1b   :  { %141 = vmatprep.subr.bf16.mxu0 %v371_v1  ;;  %316 = vmatprep.subr.bf16.mxu1 %v371_v1 }
  0x1e   :  { %142 = vmatpush1.bf16.msra.mxu0 %v339_v10  ;;  %325 = vmatpush1.bf16.msra.mxu1 %v339_v10 }
  0x1f   :  { %143 = vmatprep.subr.bf16.mxu0 %v371_v1  ;;  %317 = vmatprep.subr.bf16.mxu1 %v371_v1 }
  0x22   :  { %144 = vmatpush1.bf16.msra.mxu0 %v340_v11  ;;  %326 = vmatpush1.bf16.msra.mxu1 %v340_v11 }
  0x23   :  { %303 = vmatprep.subr.bf16.mxu1 %v372_v14 }
  0x25   :  { %160 = vmatmul.mubr.bf16.vlgmr.msra.gmra.mrb[0].mxu0 %v341_v12  ;;  %168 = vmatmul.mubr.bf16.vlgmr.msra.gmra.mrb[0].mxu1 %v344_v13 }
  0x26   :  { %300 = vmatprep.mubr.msk.f32.mxu1 %vm373_vm1, %v374_v15 }
  0xf8   :  { %v161_v17 = vpop.f32.mrb[0].mxu0  ;;  %v169_v18 = vpop.f32.mrb[0].mxu1 }
  0xf9   :  { %v162_v19 = vadd.f32 %v270_v16, %v161_v17  ;;  %v163_v20 = vpop.f32.mrb[1].mxu0  ;;  %v170_v21 = vadd.f32 %v270_v16, %v169_v18  ;;  %v171_v22 = vpop.f32.mrb[1].mxu1 }
  0xfa   :  { %v164_v23 = vpop.f32.mrb[2].mxu0  ;;  %v172_v24 = vpop.f32.mrb[2].mxu1 }
  0xfb   :  { %v178_v25 = vmax.f32 %v170_v21, 0.0  ;;  %v165_v26 = vadd.f32 %v270_v16, %v164_v23  ;;  %v166_v27 = vpop.f32.mrb[3].mxu0  ;;  %v173_v28 = vadd.f32 %v270_v16, %v172_v24  ;;  %v174_v29 = vpop.f32.mrb[3].mxu1  ;;  %v176_v30 = vmax.f32 %v162_v19, 0.0 }
  0xfd   :  { %v177_v31 = vmax.f32 %v165_v26, 0.0  ;;  %v179_v32 = vmax.f32 %v173_v28, 0.0 }
  0xff   :  { %v304_v33 = vpack.c.bf16 %v177_v31, %v176_v30  ;;  %v307_v34 = vpack.c.bf16 %v179_v32, %v178_v25 }
 0x101   :  { %305 = vmatpush3.bf16.msra.mxu1 %v304_v33 }
 0x102   :  { %306 = vmatprep.subr.bf16.mxu1 %v372_v14 }
 0x105   :  { %308 = vmatpush3.bf16.msra.mxu1 %v307_v34 }
 0x108   :  { %301 = vmatmul.mubr.msk.f32.vlgmr.msra.gmra.mrb[4].mxu1 %vm181_vm2, %v180_v35 }
 0x1db   :  { %v251_v36 = vpop.f32.mrb[4].mxu1 }
 0x1dc   :  { %255 = vst [vmem:[#allocation2] sm:$0x3] %v251_v36  ;;  %v302_v37 = vpop.f32.mrb[5].mxu1 }
 0x1dd   :  { %358 = shalt.err (!%p355_p4)
}
 0x1de   :  { %s359_s21 = scalar_lea.hbm %s462_s4, 32 }
 0x1df   :  { %p360_p5 = scmp.ne.s32.totalorder %s462_s4, %s359_s21  ;;  %p363_p6 = scmp.lt.u32.totalorder %s359_s21, %s462_s4 }
 0x1e1   :  { %p365_p7 = pnand %p363_p6, %p360_p5 }
 0x1e3   :  { %368 = shalt.err (!%p365_p7)
}
 0x1e4   :  { %265 = dma.vmem_to_hbm [thread:$0]  %s263_s17, 32, %s462_s4, [#allocation3]  }
 0x1e5   :  { %369 = dma.done.wait [#allocation3], 32  }
 0x1e6   :  { %370 = vsyncadd [#allocation3], 4294967264 }
 0x1e7   :  { %269 = vsyncpa [#allocation3], 1 }

</bundles_post_ra>
